<compile_context>
chip_gen: v7x
topology: tpu7x:2x2x1
jax: 0.10.0
libtpu: 0.0.40
codegen_flags: <defaults>
</compile_context>

<pallas_src>
import functools

import jax
import jax.numpy as jnp
from jax.experimental import pallas as pl
from jax.experimental.pallas import tpu as pltpu

BN_EPS = 1e-5
CLAMP_LO = 1e-5
CLAMP_HI = 1e6
VMEM_LIMIT = 48 * 1024 * 1024  # safe on v7x (64 MiB/TC) and v5e/v6e (128 MiB)


def _round_up(n, m):
    return ((n + m - 1) // m) * m


def _pad_to(a, rows, cols):
    """Zero-pad a 2-D array only if needed (avoids no-op HBM copies)."""
    r, c = a.shape
    if r == rows and c == cols:
        return a
    return jnp.pad(a, ((0, rows - r), (0, cols - c)))


# ---------------------------------------------------------------------------
# Pass 1: batch statistics -> fused BN scale/shift rows (one pass over x).
# Grid = (n_k, n_b); b (last) is the reduction axis, outputs stay resident.
# ---------------------------------------------------------------------------
def _stats_kernel(x_ref, gamma_ref, beta_ref, s_ref, t_ref, *, inv_b):
    b = pl.program_id(1)

    @pl.when(b == 0)
    def _():
        s_ref[...] = jnp.zeros_like(s_ref)
        t_ref[...] = jnp.zeros_like(t_ref)

    x = x_ref[...]                                     # (TB, TKs) f32
    s_ref[...] += jnp.sum(x, axis=0, keepdims=True)    # column sums (VPU/XLU)
    t_ref[...] += jnp.sum(x * x, axis=0, keepdims=True)

    @pl.when(b == pl.num_programs(1) - 1)
    def _():
        mu = s_ref[...] * inv_b                        # (1, TKs)
        var = jnp.maximum(t_ref[...] * inv_b - mu * mu, 0.0)   # biased var
        sc = gamma_ref[...] * jax.lax.rsqrt(var + BN_EPS)
        s_ref[...] = sc                                # s = gamma * rsqrt(var+eps)
        t_ref[...] = beta_ref[...] - mu * sc           # t = beta - mu * s


# ---------------------------------------------------------------------------
# Pass 2: BN fused into the matmul prologue, exp+clamp epilogue.
# Grid = (n_b, n_o, n_k) -> ("parallel", "parallel", "arbitrary").
# The f32 output block is the k-resident accumulator (no scratch).
# ---------------------------------------------------------------------------
def _matmul_kernel(x_ref, s_ref, t_ref, w_ref, b_ref, out_ref):
    k = pl.program_id(2)

    @pl.when(k == 0)
    def _():
        out_ref[...] = jnp.zeros_like(out_ref)

    xn = x_ref[...] * s_ref[...] + t_ref[...]          # fused BN (lane-dense rows)
    out_ref[...] += jnp.dot(xn, w_ref[...], preferred_element_type=jnp.float32)

    @pl.when(k == pl.num_programs(2) - 1)
    def _():
        y = out_ref[...] + b_ref[...]
        out_ref[...] = jnp.clip(jnp.exp(y), CLAMP_LO, CLAMP_HI).astype(out_ref.dtype)


# ---------------------------------------------------------------------------
# Wrapper
# ---------------------------------------------------------------------------
def decoder_atac(x, gamma, beta, w, b, *, tb=1024, tk=512, to=1024):
    """x: (B, entry_dim); w: (entry_dim, output_dim) (transpose of nn.Linear.weight).

    Returns (mean (B, output_dim) f32, None)."""
    B, D = x.shape
    O = w.shape[1]
    f32 = jnp.float32

    # Lane-dense tile sizes.  Double-buffered pass-2 footprint at defaults:
    # 2*(TB*TK + TK*TO + TB*TO)*4B = 16 MiB -> fits every generation at 48 MiB cap.
    TB = tb if B >= tb else _round_up(B, 8)
    TK = tk if D >= tk else _round_up(D, 128)
    TO = to if O >= to else _round_up(O, 128)
    B_pad, D_pad, O_pad = _round_up(B, TB), _round_up(D, TK), _round_up(O, TO)
    n_b, n_k, n_o = B_pad // TB, D_pad // TK, O_pad // TO

    # Stats pass: split K finer so the "parallel" axis has extent >= 2 for
    # large D (helps megacore), while still dividing D_pad exactly.
    TK_s = 256 if (TK >= 512 and TK % 256 == 0) else TK
    n_k_s = D_pad // TK_s

    # Zero-pad ONLY the dims that need it (zeros are neutral: padded gamma=0
    # => s=0, t=0 => xn=0; padded W rows/cols are 0; padded B rows don't bias
    # the stats because inv_b = 1/B uses the real batch size).
    x_p = _pad_to(x.astype(f32), B_pad, D_pad)
    g_p = _pad_to(gamma.astype(f32).reshape(1, D), 1, D_pad)
    be_p = _pad_to(beta.astype(f32).reshape(1, D), 1, D_pad)
    w_p = _pad_to(w.astype(f32), D_pad, O_pad)
    b_p = _pad_to(b.astype(f32).reshape(1, O), 1, O_pad)

    # ---- pass 1: batch stats -> lane-dense (1, D_pad) rows s, t -------------
    s_row, t_row = pl.pallas_call(
        functools.partial(_stats_kernel, inv_b=1.0 / B),
        out_shape=(jax.ShapeDtypeStruct((1, D_pad), f32),
                   jax.ShapeDtypeStruct((1, D_pad), f32)),
        grid=(n_k_s, n_b),
        in_specs=[
            pl.BlockSpec((TB, TK_s), lambda k, bb: (bb, k)),   # x
            pl.BlockSpec((1, TK_s), lambda k, bb: (0, k)),     # gamma
            pl.BlockSpec((1, TK_s), lambda k, bb: (0, k)),     # beta
        ],
        out_specs=(pl.BlockSpec((1, TK_s), lambda k, bb: (0, k)),
                   pl.BlockSpec((1, TK_s), lambda k, bb: (0, k))),
        compiler_params=pltpu.CompilerParams(
            dimension_semantics=("parallel", "arbitrary"),
            vmem_limit_bytes=VMEM_LIMIT),
    )(x_p, g_p, be_p)

    # ---- pass 2: (x*s + t) @ W + b, exp, clamp --------------------------------
    cost = pl.CostEstimate(
        flops=2 * B_pad * D_pad * O_pad + 2 * B_pad * D_pad,
        transcendentals=B_pad * O_pad,
        bytes_accessed=4 * (B_pad * D_pad            # x read once
                            + n_b * D_pad * O_pad    # W re-read per batch tile
                            + B_pad * O_pad))        # out written once

    out = pl.pallas_call(
        _matmul_kernel,
        out_shape=jax.ShapeDtypeStruct((B_pad, O_pad), f32),
        grid=(n_b, n_o, n_k),
        in_specs=[
            pl.BlockSpec((TB, TK), lambda i, j, k: (i, k)),   # x
            pl.BlockSpec((1, TK), lambda i, j, k: (0, k)),    # s row
            pl.BlockSpec((1, TK), lambda i, j, k: (0, k)),    # t row
            pl.BlockSpec((TK, TO), lambda i, j, k: (k, j)),   # W (original)
            pl.BlockSpec((1, TO), lambda i, j, k: (0, j)),    # bias (original)
        ],
        out_specs=pl.BlockSpec((TB, TO), lambda i, j, k: (i, j)),
        compiler_params=pltpu.CompilerParams(
            dimension_semantics=("parallel", "parallel", "arbitrary"),
            vmem_limit_bytes=VMEM_LIMIT),
        cost_estimate=cost,
    )(x_p, s_row, t_row, w_p, b_p)

    if B_pad != B or O_pad != O:
        out = out[:B, :O]
    return out, None


# ---------------------------------------------------------------------------
# Pure-JAX reference (PyTorch training-mode semantics)
# ---------------------------------------------------------------------------
def reference(x, gamma, beta, w, b):
    mu = jnp.mean(x, axis=0, keepdims=True)
    var = jnp.mean((x - mu) ** 2, axis=0, keepdims=True)      # biased variance
    xn = (x - mu) * jax.lax.rsqrt(var + BN_EPS) * gamma[None, :] + beta[None, :]
    y = xn @ w + b[None, :]
    return jnp.clip(jnp.exp(y), CLAMP_LO, CLAMP_HI)


if __name__ == "__main__":
    key = jax.random.PRNGKey(0)
    B, entry_dim, output_dim = 8, 32, 16

    k_x, k_g, k_b, k_w, k_bias = jax.random.split(key, 5)
    x = jax.random.normal(k_x, (B, entry_dim), dtype=jnp.float32)

    # Deterministic synthetic parameters (shapes match nn.BatchNorm1d / nn.Linear).
    gamma = 1.0 + 0.1 * jax.random.normal(k_g, (entry_dim,), dtype=jnp.float32)
    beta = 0.1 * jax.random.normal(k_b, (entry_dim,), dtype=jnp.float32)
    bound = 1.0 / jnp.sqrt(entry_dim)
    w = jax.random.uniform(k_w, (entry_dim, output_dim), jnp.float32, -bound, bound)
    bias = jax.random.uniform(k_bias, (output_dim,), jnp.float32, -bound, bound)

    mean, second = decoder_atac(x, gamma, beta, w, bias)
    mean = jax.block_until_ready(mean)

    ref = reference(x, gamma, beta, w, bias)
    assert second is None
    assert mean.shape == (B, output_dim)
    assert jnp.allclose(mean, ref, rtol=1e-5, atol=1e-5), (
        f"mismatch vs reference, max abs err = {jnp.max(jnp.abs(mean - ref))}")

    print("KERNEL_OK")
</pallas_src>

<mosaic_0001>
module attributes {stable_mosaic.version = 11 : i64} {
  func.func @_stats_kernel(%arg0: i32, %arg1: i32, %arg2: memref<8x128xf32, #tpu.memory_space<vmem>>, %arg3: memref<1x128xf32, #tpu.memory_space<vmem>>, %arg4: memref<1x128xf32, #tpu.memory_space<vmem>>, %arg5: memref<1x128xf32, #tpu.memory_space<vmem>>, %arg6: memref<1x128xf32, #tpu.memory_space<vmem>>) attributes {dimension_semantics = [#tpu.dimension_semantics<parallel>, #tpu.dimension_semantics<arbitrary>], iteration_bounds = array<i64: 1, 1>, scalar_prefetch = 0 : i64, scratch_operands = 0 : i64, tpu.core_type = #tpu.core_type<tc>, window_params = [{transform_indices = @transform_0, window_bounds = array<i64: 8, 128>}, {transform_indices = @transform_1, window_bounds = array<i64: 1, 128>}, {transform_indices = @transform_2, window_bounds = array<i64: 1, 128>}, {transform_indices = @transform_3, window_bounds = array<i64: 1, 128>}, {transform_indices = @transform_4, window_bounds = array<i64: 1, 128>}]} {
    %c0_i32 = arith.constant 0 : i32
    %0 = arith.cmpi eq, %arg1, %c0_i32 : i32
    %1 = arith.extui %0 : i1 to i32
    %c0_i32_0 = arith.constant 0 : i32
    %2 = arith.cmpi ne, %1, %c0_i32_0 : i32
    scf.if %2 {
      %cst_13 = arith.constant 0.000000e+00 : f32
      %18 = vector.broadcast %cst_13 : f32 to vector<1x128xf32>
      %c0_14 = arith.constant 0 : index
      %c0_15 = arith.constant 0 : index
      %19 = vector.load %arg5[%c0_14, %c0_15] : memref<1x128xf32, #tpu.memory_space<vmem>>, vector<1x128xf32>
      tpu.vector_store %arg5[%c0_14, %c0_15], %18 {strides = array<i32>} : memref<1x128xf32, #tpu.memory_space<vmem>>, vector<1x128xf32>,
      %cst_16 = arith.constant 0.000000e+00 : f32
      %20 = vector.broadcast %cst_16 : f32 to vector<1x128xf32>
      %c0_17 = arith.constant 0 : index
      %c0_18 = arith.constant 0 : index
      %21 = vector.load %arg6[%c0_17, %c0_18] : memref<1x128xf32, #tpu.memory_space<vmem>>, vector<1x128xf32>
      tpu.vector_store %arg6[%c0_17, %c0_18], %20 {strides = array<i32>} : memref<1x128xf32, #tpu.memory_space<vmem>>, vector<1x128xf32>,
    } else {
    }
    %c0 = arith.constant 0 : index
    %c0_1 = arith.constant 0 : index
    %3 = vector.load %arg2[%c0, %c0_1] : memref<8x128xf32, #tpu.memory_space<vmem>>, vector<8x128xf32>
    %c0_2 = arith.constant 0 : index
    %c0_3 = arith.constant 0 : index
    %4 = vector.load %arg5[%c0_2, %c0_3] : memref<1x128xf32, #tpu.memory_space<vmem>>, vector<1x128xf32>
    %cst = arith.constant dense<0.000000e+00> : vector<128xf32>
    %5 = vector.multi_reduction <add>, %3, %cst [0] : vector<8x128xf32> to vector<128xf32>
    %6 = vector.shape_cast %5 : vector<128xf32> to vector<1x128xf32>
    %7 = arith.addf %4, %6 : vector<1x128xf32>
    %c0_4 = arith.constant 0 : index
    %c0_5 = arith.constant 0 : index
    %8 = vector.load %arg5[%c0_4, %c0_5] : memref<1x128xf32, #tpu.memory_space<vmem>>, vector<1x128xf32>
    tpu.vector_store %arg5[%c0_4, %c0_5], %7 {strides = array<i32>} : memref<1x128xf32, #tpu.memory_space<vmem>>, vector<1x128xf32>,
    %c0_6 = arith.constant 0 : index
    %c0_7 = arith.constant 0 : index
    %9 = vector.load %arg6[%c0_6, %c0_7] : memref<1x128xf32, #tpu.memory_space<vmem>>, vector<1x128xf32>
    %10 = arith.mulf %3, %3 : vector<8x128xf32>
    %cst_8 = arith.constant dense<0.000000e+00> : vector<128xf32>
    %11 = vector.multi_reduction <add>, %10, %cst_8 [0] : vector<8x128xf32> to vector<128xf32>
    %12 = vector.shape_cast %11 : vector<128xf32> to vector<1x128xf32>
    %13 = arith.addf %9, %12 : vector<1x128xf32>
    %c0_9 = arith.constant 0 : index
    %c0_10 = arith.constant 0 : index
    %14 = vector.load %arg6[%c0_9, %c0_10] : memref<1x128xf32, #tpu.memory_space<vmem>>, vector<1x128xf32>
    tpu.vector_store %arg6[%c0_9, %c0_10], %13 {strides = array<i32>} : memref<1x128xf32, #tpu.memory_space<vmem>>, vector<1x128xf32>,
    %c0_i32_11 = arith.constant 0 : i32
    %15 = arith.cmpi eq, %arg1, %c0_i32_11 : i32
    %16 = arith.extui %15 : i1 to i32
    %c0_i32_12 = arith.constant 0 : i32
    %17 = arith.cmpi ne, %16, %c0_i32_12 : i32
    scf.if %17 {
      %c0_13 = arith.constant 0 : index
      %c0_14 = arith.constant 0 : index
      %18 = vector.load %arg5[%c0_13, %c0_14] : memref<1x128xf32, #tpu.memory_space<vmem>>, vector<1x128xf32>
      %cst_15 = arith.constant 1.250000e-01 : f32
      %19 = vector.broadcast %cst_15 : f32 to vector<1x128xf32>
      %20 = arith.mulf %18, %19 : vector<1x128xf32>
      %c0_16 = arith.constant 0 : index
      %c0_17 = arith.constant 0 : index
      %21 = vector.load %arg6[%c0_16, %c0_17] : memref<1x128xf32, #tpu.memory_space<vmem>>, vector<1x128xf32>
      %cst_18 = arith.constant 1.250000e-01 : f32
      %22 = vector.broadcast %cst_18 : f32 to vector<1x128xf32>
      %23 = arith.mulf %21, %22 : vector<1x128xf32>
      %24 = arith.mulf %20, %20 : vector<1x128xf32>
      %25 = arith.subf %23, %24 : vector<1x128xf32>
      %cst_19 = arith.constant 0.000000e+00 : f32
      %26 = vector.broadcast %cst_19 : f32 to vector<1x128xf32>
      %27 = arith.maximumf %25, %26 : vector<1x128xf32>
      %c0_20 = arith.constant 0 : index
      %c0_21 = arith.constant 0 : index
      %28 = vector.load %arg3[%c0_20, %c0_21] : memref<1x128xf32, #tpu.memory_space<vmem>>, vector<1x128xf32>
      %cst_22 = arith.constant 9.99999974E-6 : f32
      %29 = vector.broadcast %cst_22 : f32 to vector<1x128xf32>
      %30 = arith.addf %27, %29 : vector<1x128xf32>
      %31 = math.rsqrt %30 : vector<1x128xf32>
      %32 = arith.mulf %28, %31 : vector<1x128xf32>
      %c0_23 = arith.constant 0 : index
      %c0_24 = arith.constant 0 : index
      %33 = vector.load %arg5[%c0_23, %c0_24] : memref<1x128xf32, #tpu.memory_space<vmem>>, vector<1x128xf32>
      tpu.vector_store %arg5[%c0_23, %c0_24], %32 {strides = array<i32>} : memref<1x128xf32, #tpu.memory_space<vmem>>, vector<1x128xf32>,
      %c0_25 = arith.constant 0 : index
      %c0_26 = arith.constant 0 : index
      %34 = vector.load %arg4[%c0_25, %c0_26] : memref<1x128xf32, #tpu.memory_space<vmem>>, vector<1x128xf32>
      %35 = arith.mulf %20, %32 : vector<1x128xf32>
      %36 = arith.subf %34, %35 : vector<1x128xf32>
      %c0_27 = arith.constant 0 : index
      %c0_28 = arith.constant 0 : index
      %37 = vector.load %arg6[%c0_27, %c0_28] : memref<1x128xf32, #tpu.memory_space<vmem>>, vector<1x128xf32>
      tpu.vector_store %arg6[%c0_27, %c0_28], %36 {strides = array<i32>} : memref<1x128xf32, #tpu.memory_space<vmem>>, vector<1x128xf32>,
    } else {
    }
    return
  }
  func.func @transform_0(%arg0: i32, %arg1: i32) -> (i32, i32) {
    %c0_i32 = arith.constant 0 : i32
    return %arg1, %arg0 : i32, i32
  }
  func.func @transform_1(%arg0: i32, %arg1: i32) -> (i32, i32) {
    %c0_i32 = arith.constant 0 : i32
    %c0_i32_0 = arith.constant 0 : i32
    return %c0_i32, %arg0 : i32, i32
  }
  func.func @transform_2(%arg0: i32, %arg1: i32) -> (i32, i32) {
    %c0_i32 = arith.constant 0 : i32
    %c0_i32_0 = arith.constant 0 : i32
    return %c0_i32, %arg0 : i32, i32
  }
  func.func @transform_3(%arg0: i32, %arg1: i32) -> (i32, i32) {
    %c0_i32 = arith.constant 0 : i32
    %c0_i32_0 = arith.constant 0 : i32
    return %c0_i32, %arg0 : i32, i32
  }
  func.func @transform_4(%arg0: i32, %arg1: i32) -> (i32, i32) {
    %c0_i32 = arith.constant 0 : i32
    %c0_i32_0 = arith.constant 0 : i32
    return %c0_i32, %arg0 : i32, i32
  }
}

</mosaic_0001>

<bundles_post_ra>
// kernel: tpu_custom_call.1
= control target key start
LH: loop header
LB: loop body
LE: loop exit
PB: predicated region body
PF: predicated region fallthrough
CT: control target
= control target key end

     0   :  { %10 = vsyncpa [#allocation3], 0  ;;  %s253_s0 = inlined_call_operand.hbm [shape: f32[8,128], index: 0, kind: input, shape index: {}]   ;;  %s254_s1 = inlined_call_operand.vmem [shape: f32[1,128], index: 1, kind: input, shape index: {}]   ;;  %s255_s2 = inlined_call_operand.vmem [shape: f32[1,128], index: 2, kind: input, shape index: {}]   ;;  %s256_s3 = inlined_call_operand.hbm [shape: f32[1,128], index: 3, kind: output, shape index: {0}]   ;;  %s257_s4 = inlined_call_operand.hbm [shape: f32[1,128], index: 4, kind: output, shape index: {1}]  }
   0x1   :  { %11 = vsyncpa [#allocation4], 0 }
   0x2   :  { %12 = vsyncpa [#allocation7], 0  ;;  %s182_s15 = smov [#allocation2]   ;;  %s110_s19 = scalar_lea.hbm %s253_s0, 128 }
   0x3   :  { %s19_s16 = sshll.u32 %s182_s15, 4  ;;  %p111_p0 = scmp.ne.s32.totalorder %s253_s0, %s110_s19  ;;  %s20_s16 = int_to_ptr.vmem [resolvable:$true] %s19_s16 }
   0x4   :  { %p114_p1 = scmp.lt.u32.totalorder %s110_s19, %s253_s0 }
   0x6   :  { %p116_p2 = pnand %p114_p1, %p111_p0 }
   0x8   :  { %119 = shalt.err (!%p116_p2)
}
   0x9   :  { %s120_s24 = scalar_lea.vmem %s20_s16, 128  ;;  %p125_p4 = scmp.lt.s32.totalorder %s20_s16, %s20_s16 }
   0xa   :  { %p121_p3 = scmp.ne.s32.totalorder %s20_s16, %s120_s24  ;;  %p126_p5 = scmp.lt.s32.totalorder %s120_s24, %s120_s24 }
   0xc   :  { %p127_p6 = por %p126_p5, %p125_p4 }
   0xe   :  { %p128_p7 = pnand %p127_p6, %p121_p3 }
  0x10   :  { %131 = shalt.err (!%p128_p7)
}
  0x11   :  { %22 = dma.hbm_to_vmem [thread:$0]  %s253_s0, 128, %s20_s16, [#allocation3]  }
  0x12   :  { %176 = dma.done.wait [#allocation3], 128  }
  0x13   :  { %177 = vsyncadd [#allocation3], 4294967168  ;;  %v183_v0 = vmov 0.0   ;;  %v36_v1 = vld [vmem:[#allocation2] sm:$0xff]  ;;  %s184_s28 = smov [#allocation5]   ;;  %s185_s6 = smov [#allocation6]  }
  0x14   :  { %34 = vst [vmem:[#allocation5] sm:$0x1] %v183_v0  ;;  %35 = vst [vmem:[#allocation6] sm:$0x1] %v183_v0  ;;  %v38_v2 = vrot.slane %v36_v1, 4  ;;  %v47_v3 = vmul.f32 %v36_v1, %v36_v1  ;;  %s81_s29 = sshll.u32 %s184_s28, 4  ;;  %s82_s29 = int_to_ptr.vmem [resolvable:$true] %s81_s29 }
  0x15   :  { %v66_v27 = vld [vmem:[%s254_s1] sm:$0x1]  ;;  %s91_s7 = sshll.u32 %s185_s6, 4  ;;  %s132_s8 = scalar_lea.vmem %s82_s29, 16  ;;  %s92_s7 = int_to_ptr.vmem [resolvable:$true] %s91_s7 }
  0x16   :  { %v39_v4 = vadd.f32 %v38_v2, %v36_v1  ;;  %v48_v5 = vrot.slane %v47_v3, 4  ;;  %v71_v30 = vld [vmem:[%s255_s2] sm:$0x1]  ;;  %p133_p8 = scmp.ne.s32.totalorder %s82_s29, %s132_s8  ;;  %s136_s9 = scalar_lea.vmem %s82_s29, 32 }
  0x17   :  { %p137_p9 = scmp.lt.s32.totalorder %s82_s29, %s82_s29  ;;  %p138_p10 = scmp.lt.s32.totalorder %s136_s9, %s132_s8 }
  0x18   :  { %v40_v6 = vrot.slane %v39_v4, 2  ;;  %v49_v7 = vadd.f32 %v48_v5, %v47_v3 }
  0x19   :  { %p139_p11 = por %p138_p10, %p137_p9 }
  0x1a   :  { %v41_v8 = vadd.f32 %v40_v6, %v39_v4  ;;  %v50_v9 = vrot.slane %v49_v7, 2 }
  0x1b   :  { %v37_v12 = vld [vmem:[#allocation5] sm:$0x1]  ;;  %v46_v15 = vld [vmem:[#allocation6] sm:$0x1]  ;;  %p140_p12 = pnand %p139_p11, %p133_p8 }
  0x1c   :  { %v42_v10 = vrot.slane %v41_v8, 1  ;;  %v51_v11 = vadd.f32 %v50_v9, %v49_v7 }
  0x1e   :  { %v43_v13 = vadd.f32 %v42_v10, %v41_v8  ;;  %v52_v14 = vrot.slane %v51_v11, 1 }
  0x20   :  { %v44_v16 = vadd.f32 %v43_v13, %v37_v12  ;;  %v53_v17 = vadd.f32 %v52_v14, %v51_v11 }
  0x22   :  { %45 = vst [vmem:[#allocation5] sm:$0x1] %v44_v16  ;;  %v54_v18 = vadd.f32 %v53_v17, %v46_v15 }
  0x24   :  { %55 = vst [vmem:[#allocation6] sm:$0x1] %v54_v18 }
  0x29   :  { %v59_v19 = vld [vmem:[#allocation5] sm:$0x1] }
  0x2a   :  { %v60_v20 = vmul.f32 0.125, %v59_v19 }
  0x2b   :  { %v61_v21 = vld [vmem:[#allocation6] sm:$0x1] }
  0x2c   :  { %v62_v22 = vmul.f32 0.125, %v61_v21  ;;  %v63_v23 = vmul.f32 %v60_v20, %v60_v20 }
  0x2e   :  { %v64_v24 = vsub.f32 %v62_v22, %v63_v23 }
  0x30   :  { %v65_v25 = vmax.f32 %v64_v24, 0.0 }
  0x32   :  { %v67_v26 = vadd.f32 1e-05, %v65_v25 }
  0x34   :  { %108 = vrsqrt.f32 %v67_v26 }
  0x3e   :  { %v109_v28 = vpop.eup %108 }
  0x3f   :  { %v69_v29 = vmul.f32 %v109_v28, %v66_v27 }
  0x41   :  { %70 = vst [vmem:[#allocation5] sm:$0x1] %v69_v29  ;;  %v72_v31 = vmul.f32 %v69_v29, %v60_v20 }
  0x42   :  { %143 = shalt.err (!%p140_p12)
}
  0x43   :  { %s144_s11 = scalar_lea.hbm %s256_s3, 16 }
  0x44   :  { %p145_p13 = scmp.ne.s32.totalorder %s256_s3, %s144_s11  ;;  %p148_p0 = scmp.lt.u32.totalorder %s144_s11, %s256_s3 }
  0x46   :  { %p150_p1 = pnand %p148_p0, %p145_p13 }
  0x48   :  { %153 = shalt.err (!%p150_p1)
}
  0x49   :  { %84 = dma.vmem_to_hbm [thread:$0]  %s82_s29, 16, %s256_s3, [#allocation4]   ;;  %v73_v32 = vsub.f32 %v71_v30, %v72_v31 }
  0x4a   :  { %s154_s17 = scalar_lea.vmem %s92_s7, 16  ;;  %s158_s18 = scalar_lea.vmem %s92_s7, 32 }
  0x4b   :  { %74 = vst [vmem:[#allocation6] sm:$0x1] %v73_v32  ;;  %p155_p2 = scmp.ne.s32.totalorder %s92_s7, %s154_s17  ;;  %p159_p3 = scmp.lt.s32.totalorder %s92_s7, %s92_s7 }
  0x4c   :  { %p160_p4 = scmp.lt.s32.totalorder %s158_s18, %s154_s17 }
  0x4e   :  { %p161_p5 = por %p160_p4, %p159_p3 }
  0x50   :  { %p162_p6 = pnand %p161_p5, %p155_p2 }
  0x52   :  { %165 = shalt.err (!%p162_p6)
}
  0x53   :  { %s166_s21 = scalar_lea.hbm %s257_s4, 16 }
  0x54   :  { %p167_p7 = scmp.ne.s32.totalorder %s257_s4, %s166_s21  ;;  %p170_p8 = scmp.lt.u32.totalorder %s166_s21, %s257_s4 }
  0x56   :  { %p172_p9 = pnand %p170_p8, %p167_p7 }
  0x58   :  { %175 = shalt.err (!%p172_p9)
}
  0x59   :  { %94 = dma.vmem_to_hbm [thread:$0]  %s92_s7, 16, %s257_s4, [#allocation7]  }
  0x5a   :  { %178 = dma.done.wait [#allocation4], 16  }
  0x5b   :  { %179 = vsyncadd [#allocation4], 4294967280 }
  0x5c   :  { %180 = dma.done.wait [#allocation7], 16  }
  0x5d   :  { %181 = vsyncadd [#allocation7], 4294967280 }
  0x5e   :  { %101 = vsyncpa [#allocation3], 1 }
  0x5f   :  { %102 = vsyncpa [#allocation4], 1 }
  0x60   :  { %103 = vsyncpa [#allocation7], 1 }

</bundles_post_ra>
